<compile_context>
chip_gen: v5e
topology: v5e:2x2
jax: 0.10.0
libtpu: 0.0.40
codegen_flags: <defaults>
</compile_context>

<pallas_src>
import functools

import numpy as np

import jax
import jax.numpy as jnp
from jax import lax
from jax.experimental import pallas as pl
from jax.experimental.pallas import tpu as pltpu


# ---------------------------------------------------------------------------
# Tiny host-side constants (grid-invariant, ~70 KiB total)
# ---------------------------------------------------------------------------
def _col_masks(H, W):
    """0/1 masks over the flattened HW grid for the dw=-1 / dw=+1 conv taps.

    row 0: zero where w == 0      (tap reads outside the image on the left)
    row 1: zero where w == W - 1  (tap reads outside the image on the right)
    """
    w = np.arange(H * W) % W
    return jnp.asarray(np.stack([(w != 0), (w != W - 1)]).astype(np.float32))


def _pool_matrix_t(H, W):
    """avg_pool2d(k=3, s=2, p=1, count_include_pad=True) as a (HW, HWp) matmul operand."""
    Hp = (H - 1) // 2 + 1
    Wp = (W - 1) // 2 + 1
    mat = np.zeros((H * W, Hp * Wp), dtype=np.float32)
    for i in range(Hp):
        for j in range(Wp):
            for dh in (-1, 0, 1):
                u = 2 * i + dh
                if not (0 <= u < H):
                    continue
                for dw in (-1, 0, 1):
                    v = 2 * j + dw
                    if 0 <= v < W:
                        mat[u * W + v, i * Wp + j] = 1.0 / 9.0
    return jnp.asarray(mat)


# ---------------------------------------------------------------------------
# Fused kernel: conv0 -> leaky_relu -> avg_pool -> conv1 -> leaky_relu
# ---------------------------------------------------------------------------
def _disc_block_kernel(x_ref, cm0_ref, w0_ref, b0_ref, pmt_ref, cm1_ref, w1_ref, b1_ref,
                       o_ref, xp0_ref, st0_ref, xp1_ref, st1_ref,
                       *, W, Wp, HW, HWp, pad, slope):
    f32 = jnp.float32
    cin = x_ref.shape[1]

    def build_tap_stack(xp_ref, st_ref, cm_ref, width, w_stride):
        # 9 shifted copies of the zero-padded activation, stacked along the
        # contraction axis (t*Cin + ci).  Shifts are static lane-offset window
        # reads (no MXU); border columns are zeroed with the tiny masks.
        for kh in range(3):
            for kw in range(3):
                off = (kh - 1) * w_stride + (kw - 1)
                sh = xp_ref[:, pl.ds(pad + off, width)]          # (Cin, width)
                if kw != 1:
                    sh = sh * cm_ref[pl.ds(kw // 2, 1), :]       # mask image borders
                st_ref[pl.ds((kh * 3 + kw) * cin, cin), :] = sh

    # ---- conv0: 3x3 "same" conv as ONE (Cin, 9*Cin) @ (9*Cin, HW) matmul ----
    xp0_ref[...] = jnp.zeros_like(xp0_ref)
    xp0_ref[:, pl.ds(pad, HW)] = x_ref[0]                        # (Cin, HW), HW on lanes
    build_tap_stack(xp0_ref, st0_ref, cm0_ref, HW, W)
    y0 = jnp.dot(w0_ref[...], st0_ref[...], preferred_element_type=f32)   # (Cin, HW)
    y0 = y0 + b0_ref[...]                                        # bias (Cin, 1) broadcast
    y0 = jnp.where(y0 > 0, y0, f32(slope) * y0)                  # LeakyReLU(0.2)

    # ---- avg_pool2d(k=3, s=2, p=1, count_include_pad=True) as one small matmul ----
    pooled = jnp.dot(y0, pmt_ref[...], preferred_element_type=f32)        # (Cin, HWp)

    # ---- conv1 on the pooled grid ----
    xp1_ref[...] = jnp.zeros_like(xp1_ref)
    xp1_ref[:, pl.ds(pad, HWp)] = pooled
    build_tap_stack(xp1_ref, st1_ref, cm1_ref, HWp, Wp)
    y1 = jnp.dot(w1_ref[...], st1_ref[...], preferred_element_type=f32)   # (Cout, HWp)
    y1 = y1 + b1_ref[...]
    y1 = jnp.where(y1 > 0, y1, f32(slope) * y1)

    o_ref[0] = y1.astype(o_ref.dtype)


def discriminator_block_pallas(x, params):
    """x: (B, Cin, H, W) float32 (NCHW) -> (B, Cout, Hp, Wp) float32."""
    B, Cin, H, W = x.shape
    Cout = params["w1"].shape[0]
    Hp = (H - 1) // 2 + 1
    Wp = (W - 1) // 2 + 1
    HW, HWp = H * W, Hp * Wp
    PAD = 128                      # lane pad for shift windows; needs >= W + 1
    assert PAD >= W + 1

    # Fold equalized-lr scale into the fused per-tap weight matrices (host side):
    #   wmat[co, t*Cin + ci] = weight[co, ci, kh, kw] * c,  t = kh*3 + kw
    w0m = (jnp.transpose(params["w0"], (0, 2, 3, 1)) * params["c0"]).reshape(Cin, 9 * Cin)
    w1m = (jnp.transpose(params["w1"], (0, 2, 3, 1)) * params["c1"]).reshape(Cout, 9 * Cin)
    b0 = (params["b0"] * params["lr_mul"]).reshape(Cin, 1).astype(jnp.float32)
    b1 = (params["b1"] * params["lr_mul"]).reshape(Cout, 1).astype(jnp.float32)

    cm0 = _col_masks(H, W)           # (2, HW)
    cm1 = _col_masks(Hp, Wp)         # (2, HWp)
    pmt = _pool_matrix_t(H, W)       # (HW, HWp)

    # NCHW -> (B, Cin, H*W): channels on sublanes, flattened spatial on lanes.
    x2d = x.reshape(B, Cin, HW)

    kernel = functools.partial(_disc_block_kernel, W=W, Wp=Wp, HW=HW, HWp=HWp,
                               pad=PAD, slope=0.2)

    out2d = pl.pallas_call(
        kernel,
        out_shape=jax.ShapeDtypeStruct((B, Cout, HWp), jnp.float32),
        grid=(B,),
        in_specs=[
            pl.BlockSpec((1, Cin, HW), lambda n: (n, 0, 0)),    # x (per-batch block)
            pl.BlockSpec((2, HW), lambda n: (0, 0)),            # conv0 border masks
            pl.BlockSpec((Cin, 9 * Cin), lambda n: (0, 0)),     # conv0 fused tap weights
            pl.BlockSpec((Cin, 1), lambda n: (0, 0)),           # conv0 bias (* lr_mul)
            pl.BlockSpec((HW, HWp), lambda n: (0, 0)),          # pooling matrix
            pl.BlockSpec((2, HWp), lambda n: (0, 0)),           # conv1 border masks
            pl.BlockSpec((Cout, 9 * Cin), lambda n: (0, 0)),    # conv1 fused tap weights
            pl.BlockSpec((Cout, 1), lambda n: (0, 0)),          # conv1 bias (* lr_mul)
        ],
        out_specs=pl.BlockSpec((1, Cout, HWp), lambda n: (n, 0, 0)),
        scratch_shapes=[
            pltpu.VMEM((Cin, HW + 2 * PAD), jnp.float32),       # zero-padded conv0 input
            pltpu.VMEM((9 * Cin, HW), jnp.float32),             # conv0 shifted-tap stack
            pltpu.VMEM((Cin, HWp + 2 * PAD), jnp.float32),      # zero-padded conv1 input
            pltpu.VMEM((9 * Cin, HWp), jnp.float32),            # conv1 shifted-tap stack
        ],
        compiler_params=pltpu.CompilerParams(dimension_semantics=("parallel",)),
    )(x2d, cm0, w0m, b0, pmt, cm1, w1m, b1)

    return out2d.reshape(B, Cout, Hp, Wp)


# ---------------------------------------------------------------------------
# Parameters + pure-JAX reference (mirrors the PyTorch module semantics)
# ---------------------------------------------------------------------------
def init_discriminator_block_params(key, in_features, out_features, lr_mul=1.0):
    k0, k1 = jax.random.split(key)
    w0 = jax.random.normal(k0, (in_features, in_features, 3, 3), jnp.float32) / lr_mul
    b0 = jnp.zeros((in_features,), jnp.float32)
    c0 = 1.0 / np.sqrt(in_features * 3 * 3) * lr_mul
    w1 = jax.random.normal(k1, (out_features, in_features, 3, 3), jnp.float32) / lr_mul
    b1 = jnp.zeros((out_features,), jnp.float32)
    c1 = 1.0 / np.sqrt(in_features * 3 * 3) * lr_mul
    return dict(w0=w0, b0=b0, c0=float(c0),
                w1=w1, b1=b1, c1=float(c1), lr_mul=lr_mul)


def discriminator_block_reference(x, params):
    w0 = params["w0"] * params["c0"]
    b0 = params["b0"] * params["lr_mul"]
    y = lax.conv_general_dilated(x, w0, window_strides=(1, 1),
                                 padding=((1, 1), (1, 1)),
                                 dimension_numbers=("NCHW", "OIHW", "NCHW"))
    y = y + b0[None, :, None, None]
    y = jnp.where(y > 0, y, 0.2 * y)
    # avg_pool2d(k=3, s=2, p=1), count_include_pad=True -> always divide by 9
    y = lax.reduce_window(y, 0.0, lax.add, (1, 1, 3, 3), (1, 1, 2, 2),
                          ((0, 0), (0, 0), (1, 1), (1, 1))) / 9.0
    w1 = params["w1"] * params["c1"]
    b1 = params["b1"] * params["lr_mul"]
    y = lax.conv_general_dilated(y, w1, window_strides=(1, 1),
                                 padding=((1, 1), (1, 1)),
                                 dimension_numbers=("NCHW", "OIHW", "NCHW"))
    y = y + b1[None, :, None, None]
    y = jnp.where(y > 0, y, 0.2 * y)
    return y


if __name__ == "__main__":
    key = jax.random.PRNGKey(0)
    B, Cin, Cout, H, W = 2, 4, 8, 16, 16

    key, xk, pk = jax.random.split(key, 3)
    x = jax.random.normal(xk, (B, Cin, H, W), jnp.float32)
    params = init_discriminator_block_params(pk, Cin, Cout)

    out = discriminator_block_pallas(x, params)
    out = jax.block_until_ready(out)

    ref = discriminator_block_reference(x, params)
    assert out.shape == (B, Cout, 8, 8), out.shape
    assert jnp.allclose(out, ref, atol=1e-4, rtol=1e-4), "mismatch vs reference"

    print("KERNEL_OK")
</pallas_src>

<mosaic_0001>
module attributes {stable_mosaic.version = 11 : i64} {
  func.func @_disc_block_kernel(%arg0: i32, %arg1: memref<1x4x256xf32, #tpu.memory_space<vmem>>, %arg2: memref<2x256xf32, #tpu.memory_space<vmem>>, %arg3: memref<4x36xf32, #tpu.memory_space<vmem>>, %arg4: memref<4x1xf32, #tpu.memory_space<vmem>>, %arg5: memref<256x64xf32, #tpu.memory_space<vmem>>, %arg6: memref<2x64xf32, #tpu.memory_space<vmem>>, %arg7: memref<8x36xf32, #tpu.memory_space<vmem>>, %arg8: memref<8x1xf32, #tpu.memory_space<vmem>>, %arg9: memref<1x8x64xf32, #tpu.memory_space<vmem>>, %arg10: memref<4x512xf32, #tpu.memory_space<vmem>>, %arg11: memref<36x256xf32, #tpu.memory_space<vmem>>, %arg12: memref<4x320xf32, #tpu.memory_space<vmem>>, %arg13: memref<36x64xf32, #tpu.memory_space<vmem>>) attributes {dimension_semantics = [#tpu.dimension_semantics<parallel>], iteration_bounds = array<i64: 2>, scalar_prefetch = 0 : i64, scratch_operands = 4 : i64, tpu.core_type = #tpu.core_type<tc>, window_params = [{transform_indices = @transform_0, window_bounds = array<i64: 1, 4, 256>}, {pipeline_mode = #tpu.pipeline_mode<synchronous>, transform_indices = @transform_1, window_bounds = array<i64: 2, 256>}, {pipeline_mode = #tpu.pipeline_mode<synchronous>, transform_indices = @transform_2, window_bounds = array<i64: 4, 36>}, {pipeline_mode = #tpu.pipeline_mode<synchronous>, transform_indices = @transform_3, window_bounds = array<i64: 4, 1>}, {pipeline_mode = #tpu.pipeline_mode<synchronous>, transform_indices = @transform_4, window_bounds = array<i64: 256, 64>}, {pipeline_mode = #tpu.pipeline_mode<synchronous>, transform_indices = @transform_5, window_bounds = array<i64: 2, 64>}, {pipeline_mode = #tpu.pipeline_mode<synchronous>, transform_indices = @transform_6, window_bounds = array<i64: 8, 36>}, {pipeline_mode = #tpu.pipeline_mode<synchronous>, transform_indices = @transform_7, window_bounds = array<i64: 8, 1>}, {transform_indices = @transform_8, window_bounds = array<i64: 1, 8, 64>}]} {
    %cst = arith.constant 0.000000e+00 : f32
    %0 = vector.broadcast %cst : f32 to vector<4x512xf32>
    %c0 = arith.constant 0 : index
    %c0_0 = arith.constant 0 : index
    %1 = vector.load %arg10[%c0, %c0_0] : memref<4x512xf32, #tpu.memory_space<vmem>>, vector<4x512xf32>
    tpu.vector_store %arg10[%c0, %c0_0], %0 {strides = array<i32>} : memref<4x512xf32, #tpu.memory_space<vmem>>, vector<4x512xf32>,
    %c0_1 = arith.constant 0 : index
    %c0_2 = arith.constant 0 : index
    %c0_3 = arith.constant 0 : index
    %2 = vector.load %arg1[%c0_1, %c0_2, %c0_3] : memref<1x4x256xf32, #tpu.memory_space<vmem>>, vector<1x4x256xf32>
    %3 = vector.shape_cast %2 : vector<1x4x256xf32> to vector<4x256xf32>
    %c0_4 = arith.constant 0 : index
    %c128 = arith.constant 128 : index
    %4 = vector.load %arg10[%c0_4, %c128] : memref<4x512xf32, #tpu.memory_space<vmem>>, vector<4x256xf32>
    tpu.vector_store %arg10[%c0_4, %c128], %3 {strides = array<i32>} : memref<4x512xf32, #tpu.memory_space<vmem>>, vector<4x256xf32>,
    %c0_5 = arith.constant 0 : index
    %c111 = arith.constant 111 : index
    %5 = vector.load %arg10[%c0_5, %c111] : memref<4x512xf32, #tpu.memory_space<vmem>>, vector<4x256xf32>
    %c0_6 = arith.constant 0 : index
    %c0_7 = arith.constant 0 : index
    %6 = vector.load %arg2[%c0_6, %c0_7] : memref<2x256xf32, #tpu.memory_space<vmem>>, vector<1x256xf32>
    %7 = vector.broadcast %6 : vector<1x256xf32> to vector<4x256xf32>
    %8 = arith.mulf %5, %7 : vector<4x256xf32>
    %c0_8 = arith.constant 0 : index
    %c0_9 = arith.constant 0 : index
    %9 = vector.load %arg11[%c0_8, %c0_9] : memref<36x256xf32, #tpu.memory_space<vmem>>, vector<4x256xf32>
    tpu.vector_store %arg11[%c0_8, %c0_9], %8 {strides = array<i32>} : memref<36x256xf32, #tpu.memory_space<vmem>>, vector<4x256xf32>,
    %c0_10 = arith.constant 0 : index
    %c112 = arith.constant 112 : index
    %10 = vector.load %arg10[%c0_10, %c112] : memref<4x512xf32, #tpu.memory_space<vmem>>, vector<4x256xf32>
    %c4 = arith.constant 4 : index
    %c0_11 = arith.constant 0 : index
    %11 = vector.load %arg11[%c4, %c0_11] : memref<36x256xf32, #tpu.memory_space<vmem>>, vector<4x256xf32>
    tpu.vector_store %arg11[%c4, %c0_11], %10 {strides = array<i32>} : memref<36x256xf32, #tpu.memory_space<vmem>>, vector<4x256xf32>,
    %c0_12 = arith.constant 0 : index
    %c113 = arith.constant 113 : index
    %12 = vector.load %arg10[%c0_12, %c113] : memref<4x512xf32, #tpu.memory_space<vmem>>, vector<4x256xf32>
    %c1 = arith.constant 1 : index
    %c0_13 = arith.constant 0 : index
    %13 = vector.load %arg2[%c1, %c0_13] : memref<2x256xf32, #tpu.memory_space<vmem>>, vector<1x256xf32>
    %14 = vector.broadcast %13 : vector<1x256xf32> to vector<4x256xf32>
    %15 = arith.mulf %12, %14 : vector<4x256xf32>
    %c8 = arith.constant 8 : index
    %c0_14 = arith.constant 0 : index
    %16 = vector.load %arg11[%c8, %c0_14] : memref<36x256xf32, #tpu.memory_space<vmem>>, vector<4x256xf32>
    tpu.vector_store %arg11[%c8, %c0_14], %15 {strides = array<i32>} : memref<36x256xf32, #tpu.memory_space<vmem>>, vector<4x256xf32>,
    %c0_15 = arith.constant 0 : index
    %c127 = arith.constant 127 : index
    %17 = vector.load %arg10[%c0_15, %c127] : memref<4x512xf32, #tpu.memory_space<vmem>>, vector<4x256xf32>
    %c0_16 = arith.constant 0 : index
    %c0_17 = arith.constant 0 : index
    %18 = vector.load %arg2[%c0_16, %c0_17] : memref<2x256xf32, #tpu.memory_space<vmem>>, vector<1x256xf32>
    %19 = vector.broadcast %18 : vector<1x256xf32> to vector<4x256xf32>
    %20 = arith.mulf %17, %19 : vector<4x256xf32>
    %c12 = arith.constant 12 : index
    %c0_18 = arith.constant 0 : index
    %21 = vector.load %arg11[%c12, %c0_18] : memref<36x256xf32, #tpu.memory_space<vmem>>, vector<4x256xf32>
    tpu.vector_store %arg11[%c12, %c0_18], %20 {strides = array<i32>} : memref<36x256xf32, #tpu.memory_space<vmem>>, vector<4x256xf32>,
    %c0_19 = arith.constant 0 : index
    %c128_20 = arith.constant 128 : index
    %22 = vector.load %arg10[%c0_19, %c128_20] : memref<4x512xf32, #tpu.memory_space<vmem>>, vector<4x256xf32>
    %c16 = arith.constant 16 : index
    %c0_21 = arith.constant 0 : index
    %23 = vector.load %arg11[%c16, %c0_21] : memref<36x256xf32, #tpu.memory_space<vmem>>, vector<4x256xf32>
    tpu.vector_store %arg11[%c16, %c0_21], %22 {strides = array<i32>} : memref<36x256xf32, #tpu.memory_space<vmem>>, vector<4x256xf32>,
    %c0_22 = arith.constant 0 : index
    %c129 = arith.constant 129 : index
    %24 = vector.load %arg10[%c0_22, %c129] : memref<4x512xf32, #tpu.memory_space<vmem>>, vector<4x256xf32>
    %c1_23 = arith.constant 1 : index
    %c0_24 = arith.constant 0 : index
    %25 = vector.load %arg2[%c1_23, %c0_24] : memref<2x256xf32, #tpu.memory_space<vmem>>, vector<1x256xf32>
    %26 = vector.broadcast %25 : vector<1x256xf32> to vector<4x256xf32>
    %27 = arith.mulf %24, %26 : vector<4x256xf32>
    %c20 = arith.constant 20 : index
    %c0_25 = arith.constant 0 : index
    %28 = vector.load %arg11[%c20, %c0_25] : memref<36x256xf32, #tpu.memory_space<vmem>>, vector<4x256xf32>
    tpu.vector_store %arg11[%c20, %c0_25], %27 {strides = array<i32>} : memref<36x256xf32, #tpu.memory_space<vmem>>, vector<4x256xf32>,
    %c0_26 = arith.constant 0 : index
    %c143 = arith.constant 143 : index
    %29 = vector.load %arg10[%c0_26, %c143] : memref<4x512xf32, #tpu.memory_space<vmem>>, vector<4x256xf32>
    %c0_27 = arith.constant 0 : index
    %c0_28 = arith.constant 0 : index
    %30 = vector.load %arg2[%c0_27, %c0_28] : memref<2x256xf32, #tpu.memory_space<vmem>>, vector<1x256xf32>
    %31 = vector.broadcast %30 : vector<1x256xf32> to vector<4x256xf32>
    %32 = arith.mulf %29, %31 : vector<4x256xf32>
    %c24 = arith.constant 24 : index
    %c0_29 = arith.constant 0 : index
    %33 = vector.load %arg11[%c24, %c0_29] : memref<36x256xf32, #tpu.memory_space<vmem>>, vector<4x256xf32>
    tpu.vector_store %arg11[%c24, %c0_29], %32 {strides = array<i32>} : memref<36x256xf32, #tpu.memory_space<vmem>>, vector<4x256xf32>,
    %c0_30 = arith.constant 0 : index
    %c144 = arith.constant 144 : index
    %34 = vector.load %arg10[%c0_30, %c144] : memref<4x512xf32, #tpu.memory_space<vmem>>, vector<4x256xf32>
    %c28 = arith.constant 28 : index
    %c0_31 = arith.constant 0 : index
    %35 = vector.load %arg11[%c28, %c0_31] : memref<36x256xf32, #tpu.memory_space<vmem>>, vector<4x256xf32>
    tpu.vector_store %arg11[%c28, %c0_31], %34 {strides = array<i32>} : memref<36x256xf32, #tpu.memory_space<vmem>>, vector<4x256xf32>,
    %c0_32 = arith.constant 0 : index
    %c145 = arith.constant 145 : index
    %36 = vector.load %arg10[%c0_32, %c145] : memref<4x512xf32, #tpu.memory_space<vmem>>, vector<4x256xf32>
    %c1_33 = arith.constant 1 : index
    %c0_34 = arith.constant 0 : index
    %37 = vector.load %arg2[%c1_33, %c0_34] : memref<2x256xf32, #tpu.memory_space<vmem>>, vector<1x256xf32>
    %38 = vector.broadcast %37 : vector<1x256xf32> to vector<4x256xf32>
    %39 = arith.mulf %36, %38 : vector<4x256xf32>
    %c32 = arith.constant 32 : index
    %c0_35 = arith.constant 0 : index
    %40 = vector.load %arg11[%c32, %c0_35] : memref<36x256xf32, #tpu.memory_space<vmem>>, vector<4x256xf32>
    tpu.vector_store %arg11[%c32, %c0_35], %39 {strides = array<i32>} : memref<36x256xf32, #tpu.memory_space<vmem>>, vector<4x256xf32>,
    %c0_36 = arith.constant 0 : index
    %c0_37 = arith.constant 0 : index
    %41 = vector.load %arg3[%c0_36, %c0_37] : memref<4x36xf32, #tpu.memory_space<vmem>>, vector<4x36xf32>
    %c0_38 = arith.constant 0 : index
    %c0_39 = arith.constant 0 : index
    %42 = vector.load %arg11[%c0_38, %c0_39] : memref<36x256xf32, #tpu.memory_space<vmem>>, vector<36x256xf32>
    %cst_40 = arith.constant dense<0.000000e+00> : vector<4x256xf32>
    %43 = tpu.matmul %41, %42, %cst_40 {dimension_numbers = #tpu.dot_dimension_numbers<[1], [0], [0], [1], [0, 0, 1, 1], [], []>} : vector<4x36xf32>, vector<36x256xf32>, vector<4x256xf32> -> vector<4x256xf32>
    %c0_41 = arith.constant 0 : index
    %c0_42 = arith.constant 0 : index
    %44 = vector.load %arg4[%c0_41, %c0_42] : memref<4x1xf32, #tpu.memory_space<vmem>>, vector<4x1xf32>
    %45 = vector.broadcast %44 : vector<4x1xf32> to vector<4x256xf32>
    %46 = arith.addf %43, %45 : vector<4x256xf32>
    %cst_43 = arith.constant 0.000000e+00 : f32
    %47 = vector.broadcast %cst_43 : f32 to vector<4x256xf32>
    %48 = arith.cmpf ogt, %46, %47 : vector<4x256xf32>
    %cst_44 = arith.constant 2.000000e-01 : f32
    %49 = vector.broadcast %cst_44 : f32 to vector<4x256xf32>
    %50 = arith.mulf %49, %46 : vector<4x256xf32>
    %51 = arith.select %48, %46, %50 : vector<4x256xi1>, vector<4x256xf32>
    %c0_45 = arith.constant 0 : index
    %c0_46 = arith.constant 0 : index
    %52 = vector.load %arg5[%c0_45, %c0_46] : memref<256x64xf32, #tpu.memory_space<vmem>>, vector<256x64xf32>
    %cst_47 = arith.constant dense<0.000000e+00> : vector<4x64xf32>
    %53 = tpu.matmul %51, %52, %cst_47 {dimension_numbers = #tpu.dot_dimension_numbers<[1], [0], [0], [1], [0, 0, 1, 1], [], []>} : vector<4x256xf32>, vector<256x64xf32>, vector<4x64xf32> -> vector<4x64xf32>
    %cst_48 = arith.constant 0.000000e+00 : f32
    %54 = vector.broadcast %cst_48 : f32 to vector<4x320xf32>
    %c0_49 = arith.constant 0 : index
    %c0_50 = arith.constant 0 : index
    %55 = vector.load %arg12[%c0_49, %c0_50] : memref<4x320xf32, #tpu.memory_space<vmem>>, vector<4x320xf32>
    tpu.vector_store %arg12[%c0_49, %c0_50], %54 {strides = array<i32>} : memref<4x320xf32, #tpu.memory_space<vmem>>, vector<4x320xf32>,
    %c0_51 = arith.constant 0 : index
    %c128_52 = arith.constant 128 : index
    %56 = vector.load %arg12[%c0_51, %c128_52] : memref<4x320xf32, #tpu.memory_space<vmem>>, vector<4x64xf32>
    tpu.vector_store %arg12[%c0_51, %c128_52], %53 {strides = array<i32>} : memref<4x320xf32, #tpu.memory_space<vmem>>, vector<4x64xf32>,
    %c0_53 = arith.constant 0 : index
    %c119 = arith.constant 119 : index
    %57 = vector.load %arg12[%c0_53, %c119] : memref<4x320xf32, #tpu.memory_space<vmem>>, vector<4x64xf32>
    %c0_54 = arith.constant 0 : index
    %c0_55 = arith.constant 0 : index
    %58 = vector.load %arg6[%c0_54, %c0_55] : memref<2x64xf32, #tpu.memory_space<vmem>>, vector<1x64xf32>
    %59 = vector.broadcast %58 : vector<1x64xf32> to vector<4x64xf32>
    %60 = arith.mulf %57, %59 : vector<4x64xf32>
    %c0_56 = arith.constant 0 : index
    %c0_57 = arith.constant 0 : index
    %61 = vector.load %arg13[%c0_56, %c0_57] : memref<36x64xf32, #tpu.memory_space<vmem>>, vector<4x64xf32>
    tpu.vector_store %arg13[%c0_56, %c0_57], %60 {strides = array<i32>} : memref<36x64xf32, #tpu.memory_space<vmem>>, vector<4x64xf32>,
    %c0_58 = arith.constant 0 : index
    %c120 = arith.constant 120 : index
    %62 = vector.load %arg12[%c0_58, %c120] : memref<4x320xf32, #tpu.memory_space<vmem>>, vector<4x64xf32>
    %c4_59 = arith.constant 4 : index
    %c0_60 = arith.constant 0 : index
    %63 = vector.load %arg13[%c4_59, %c0_60] : memref<36x64xf32, #tpu.memory_space<vmem>>, vector<4x64xf32>
    tpu.vector_store %arg13[%c4_59, %c0_60], %62 {strides = array<i32>} : memref<36x64xf32, #tpu.memory_space<vmem>>, vector<4x64xf32>,
    %c0_61 = arith.constant 0 : index
    %c121 = arith.constant 121 : index
    %64 = vector.load %arg12[%c0_61, %c121] : memref<4x320xf32, #tpu.memory_space<vmem>>, vector<4x64xf32>
    %c1_62 = arith.constant 1 : index
    %c0_63 = arith.constant 0 : index
    %65 = vector.load %arg6[%c1_62, %c0_63] : memref<2x64xf32, #tpu.memory_space<vmem>>, vector<1x64xf32>
    %66 = vector.broadcast %65 : vector<1x64xf32> to vector<4x64xf32>
    %67 = arith.mulf %64, %66 : vector<4x64xf32>
    %c8_64 = arith.constant 8 : index
    %c0_65 = arith.constant 0 : index
    %68 = vector.load %arg13[%c8_64, %c0_65] : memref<36x64xf32, #tpu.memory_space<vmem>>, vector<4x64xf32>
    tpu.vector_store %arg13[%c8_64, %c0_65], %67 {strides = array<i32>} : memref<36x64xf32, #tpu.memory_space<vmem>>, vector<4x64xf32>,
    %c0_66 = arith.constant 0 : index
    %c127_67 = arith.constant 127 : index
    %69 = vector.load %arg12[%c0_66, %c127_67] : memref<4x320xf32, #tpu.memory_space<vmem>>, vector<4x64xf32>
    %c0_68 = arith.constant 0 : index
    %c0_69 = arith.constant 0 : index
    %70 = vector.load %arg6[%c0_68, %c0_69] : memref<2x64xf32, #tpu.memory_space<vmem>>, vector<1x64xf32>
    %71 = vector.broadcast %70 : vector<1x64xf32> to vector<4x64xf32>
    %72 = arith.mulf %69, %71 : vector<4x64xf32>
    %c12_70 = arith.constant 12 : index
    %c0_71 = arith.constant 0 : index
    %73 = vector.load %arg13[%c12_70, %c0_71] : memref<36x64xf32, #tpu.memory_space<vmem>>, vector<4x64xf32>
    tpu.vector_store %arg13[%c12_70, %c0_71], %72 {strides = array<i32>} : memref<36x64xf32, #tpu.memory_space<vmem>>, vector<4x64xf32>,
    %c0_72 = arith.constant 0 : index
    %c128_73 = arith.constant 128 : index
    %74 = vector.load %arg12[%c0_72, %c128_73] : memref<4x320xf32, #tpu.memory_space<vmem>>, vector<4x64xf32>
    %c16_74 = arith.constant 16 : index
    %c0_75 = arith.constant 0 : index
    %75 = vector.load %arg13[%c16_74, %c0_75] : memref<36x64xf32, #tpu.memory_space<vmem>>, vector<4x64xf32>
    tpu.vector_store %arg13[%c16_74, %c0_75], %74 {strides = array<i32>} : memref<36x64xf32, #tpu.memory_space<vmem>>, vector<4x64xf32>,
    %c0_76 = arith.constant 0 : index
    %c129_77 = arith.constant 129 : index
    %76 = vector.load %arg12[%c0_76, %c129_77] : memref<4x320xf32, #tpu.memory_space<vmem>>, vector<4x64xf32>
    %c1_78 = arith.constant 1 : index
    %c0_79 = arith.constant 0 : index
    %77 = vector.load %arg6[%c1_78, %c0_79] : memref<2x64xf32, #tpu.memory_space<vmem>>, vector<1x64xf32>
    %78 = vector.broadcast %77 : vector<1x64xf32> to vector<4x64xf32>
    %79 = arith.mulf %76, %78 : vector<4x64xf32>
    %c20_80 = arith.constant 20 : index
    %c0_81 = arith.constant 0 : index
    %80 = vector.load %arg13[%c20_80, %c0_81] : memref<36x64xf32, #tpu.memory_space<vmem>>, vector<4x64xf32>
    tpu.vector_store %arg13[%c20_80, %c0_81], %79 {strides = array<i32>} : memref<36x64xf32, #tpu.memory_space<vmem>>, vector<4x64xf32>,
    %c0_82 = arith.constant 0 : index
    %c135 = arith.constant 135 : index
    %81 = vector.load %arg12[%c0_82, %c135] : memref<4x320xf32, #tpu.memory_space<vmem>>, vector<4x64xf32>
    %c0_83 = arith.constant 0 : index
    %c0_84 = arith.constant 0 : index
    %82 = vector.load %arg6[%c0_83, %c0_84] : memref<2x64xf32, #tpu.memory_space<vmem>>, vector<1x64xf32>
    %83 = vector.broadcast %82 : vector<1x64xf32> to vector<4x64xf32>
    %84 = arith.mulf %81, %83 : vector<4x64xf32>
    %c24_85 = arith.constant 24 : index
    %c0_86 = arith.constant 0 : index
    %85 = vector.load %arg13[%c24_85, %c0_86] : memref<36x64xf32, #tpu.memory_space<vmem>>, vector<4x64xf32>
    tpu.vector_store %arg13[%c24_85, %c0_86], %84 {strides = array<i32>} : memref<36x64xf32, #tpu.memory_space<vmem>>, vector<4x64xf32>,
    %c0_87 = arith.constant 0 : index
    %c136 = arith.constant 136 : index
    %86 = vector.load %arg12[%c0_87, %c136] : memref<4x320xf32, #tpu.memory_space<vmem>>, vector<4x64xf32>
    %c28_88 = arith.constant 28 : index
    %c0_89 = arith.constant 0 : index
    %87 = vector.load %arg13[%c28_88, %c0_89] : memref<36x64xf32, #tpu.memory_space<vmem>>, vector<4x64xf32>
    tpu.vector_store %arg13[%c28_88, %c0_89], %86 {strides = array<i32>} : memref<36x64xf32, #tpu.memory_space<vmem>>, vector<4x64xf32>,
    %c0_90 = arith.constant 0 : index
    %c137 = arith.constant 137 : index
    %88 = vector.load %arg12[%c0_90, %c137] : memref<4x320xf32, #tpu.memory_space<vmem>>, vector<4x64xf32>
    %c1_91 = arith.constant 1 : index
    %c0_92 = arith.constant 0 : index
    %89 = vector.load %arg6[%c1_91, %c0_92] : memref<2x64xf32, #tpu.memory_space<vmem>>, vector<1x64xf32>
    %90 = vector.broadcast %89 : vector<1x64xf32> to vector<4x64xf32>
    %91 = arith.mulf %88, %90 : vector<4x64xf32>
    %c32_93 = arith.constant 32 : index
    %c0_94 = arith.constant 0 : index
    %92 = vector.load %arg13[%c32_93, %c0_94] : memref<36x64xf32, #tpu.memory_space<vmem>>, vector<4x64xf32>
    tpu.vector_store %arg13[%c32_93, %c0_94], %91 {strides = array<i32>} : memref<36x64xf32, #tpu.memory_space<vmem>>, vector<4x64xf32>,
    %c0_95 = arith.constant 0 : index
    %c0_96 = arith.constant 0 : index
    %93 = vector.load %arg7[%c0_95, %c0_96] : memref<8x36xf32, #tpu.memory_space<vmem>>, vector<8x36xf32>
    %c0_97 = arith.constant 0 : index
    %c0_98 = arith.constant 0 : index
    %94 = vector.load %arg13[%c0_97, %c0_98] : memref<36x64xf32, #tpu.memory_space<vmem>>, vector<36x64xf32>
    %cst_99 = arith.constant dense<0.000000e+00> : vector<8x64xf32>
    %95 = tpu.matmul %93, %94, %cst_99 {dimension_numbers = #tpu.dot_dimension_numbers<[1], [0], [0], [1], [0, 0, 1, 1], [], []>} : vector<8x36xf32>, vector<36x64xf32>, vector<8x64xf32> -> vector<8x64xf32>
    %c0_100 = arith.constant 0 : index
    %c0_101 = arith.constant 0 : index
    %96 = vector.load %arg8[%c0_100, %c0_101] : memref<8x1xf32, #tpu.memory_space<vmem>>, vector<8x1xf32>
    %97 = vector.broadcast %96 : vector<8x1xf32> to vector<8x64xf32>
    %98 = arith.addf %95, %97 : vector<8x64xf32>
    %cst_102 = arith.constant 0.000000e+00 : f32
    %99 = vector.broadcast %cst_102 : f32 to vector<8x64xf32>
    %100 = arith.cmpf ogt, %98, %99 : vector<8x64xf32>
    %cst_103 = arith.constant 2.000000e-01 : f32
    %101 = vector.broadcast %cst_103 : f32 to vector<8x64xf32>
    %102 = arith.mulf %101, %98 : vector<8x64xf32>
    %103 = arith.select %100, %98, %102 : vector<8x64xi1>, vector<8x64xf32>
    %c0_104 = arith.constant 0 : index
    %c0_105 = arith.constant 0 : index
    %c0_106 = arith.constant 0 : index
    %104 = vector.load %arg9[%c0_104, %c0_105, %c0_106] : memref<1x8x64xf32, #tpu.memory_space<vmem>>, vector<1x8x64xf32>
    %105 = vector.shape_cast %104 : vector<1x8x64xf32> to vector<8x64xf32>
    %106 = vector.shape_cast %103 : vector<8x64xf32> to vector<1x8x64xf32>
    tpu.vector_store %arg9[%c0_104, %c0_105, %c0_106], %106 {strides = array<i32>} : memref<1x8x64xf32, #tpu.memory_space<vmem>>, vector<1x8x64xf32>,
    return
  }
  func.func @transform_0(%arg0: i32) -> (i32, i32, i32) {
    %c0_i32 = arith.constant 0 : i32
    %c0_i32_0 = arith.constant 0 : i32
    %c0_i32_1 = arith.constant 0 : i32
    return %arg0, %c0_i32, %c0_i32_0 : i32, i32, i32
  }
  func.func @transform_1(%arg0: i32) -> (i32, i32) {
    %c0_i32 = arith.constant 0 : i32
    %c0_i32_0 = arith.constant 0 : i32
    %c0_i32_1 = arith.constant 0 : i32
    return %c0_i32, %c0_i32_0 : i32, i32
  }
  func.func @transform_2(%arg0: i32) -> (i32, i32) {
    %c0_i32 = arith.constant 0 : i32
    %c0_i32_0 = arith.constant 0 : i32
    %c0_i32_1 = arith.constant 0 : i32
    return %c0_i32, %c0_i32_0 : i32, i32
  }
  func.func @transform_3(%arg0: i32) -> (i32, i32) {
    %c0_i32 = arith.constant 0 : i32
    %c0_i32_0 = arith.constant 0 : i32
    %c0_i32_1 = arith.constant 0 : i32
    return %c0_i32, %c0_i32_0 : i32, i32
  }
  func.func @transform_4(%arg0: i32) -> (i32, i32) {
    %c0_i32 = arith.constant 0 : i32
    %c0_i32_0 = arith.constant 0 : i32
    %c0_i32_1 = arith.constant 0 : i32
    return %c0_i32, %c0_i32_0 : i32, i32
  }
  func.func @transform_5(%arg0: i32) -> (i32, i32) {
    %c0_i32 = arith.constant 0 : i32
    %c0_i32_0 = arith.constant 0 : i32
    %c0_i32_1 = arith.constant 0 : i32
    return %c0_i32, %c0_i32_0 : i32, i32
  }
  func.func @transform_6(%arg0: i32) -> (i32, i32) {
    %c0_i32 = arith.constant 0 : i32
    %c0_i32_0 = arith.constant 0 : i32
    %c0_i32_1 = arith.constant 0 : i32
    return %c0_i32, %c0_i32_0 : i32, i32
  }
  func.func @transform_7(%arg0: i32) -> (i32, i32) {
    %c0_i32 = arith.constant 0 : i32
    %c0_i32_0 = arith.constant 0 : i32
    %c0_i32_1 = arith.constant 0 : i32
    return %c0_i32, %c0_i32_0 : i32, i32
  }
  func.func @transform_8(%arg0: i32) -> (i32, i32, i32) {
    %c0_i32 = arith.constant 0 : i32
    %c0_i32_0 = arith.constant 0 : i32
    %c0_i32_1 = arith.constant 0 : i32
    return %arg0, %c0_i32, %c0_i32_0 : i32, i32, i32
  }
}

</mosaic_0001>

<bundles_post_ra>
// kernel: tpu_custom_call.1
= control target key start
LH: loop header
LB: loop body
LE: loop exit
PB: predicated region body
PF: predicated region fallthrough
CT: control target
= control target key end

     0   :  { %13 = vsyncpa [#allocation7], 0  ;;  %s1529_s0 = inlined_call_operand.vmem [shape: f32[2,4,256], index: 0, kind: input, shape index: {}]   ;;  %s1530_s1 = inlined_call_operand.vmem [shape: f32[2,256], index: 1, kind: input, shape index: {}]   ;;  %s1531_s2 = inlined_call_operand.vmem [shape: f32[4,36], index: 2, kind: input, shape index: {}]   ;;  %s1532_s3 = inlined_call_operand.vmem [shape: f32[4,1], index: 3, kind: input, shape index: {}]   ;;  %s1533_s4 = inlined_call_operand.vmem [shape: f32[256,64], index: 4, kind: input, shape index: {}]   ;;  %s1534_s5 = inlined_call_operand.vmem [shape: f32[2,64], index: 5, kind: input, shape index: {}]   ;;  %s1535_s6 = inlined_call_operand.vmem [shape: f32[8,36], index: 6, kind: input, shape index: {}]   ;;  %s1536_s7 = inlined_call_operand.vmem [shape: f32[8,1], index: 7, kind: input, shape index: {}]   ;;  %s1537_s8 = inlined_call_operand.hbm [shape: f32[2,8,64], index: 8, kind: output, shape index: {}]  }
   0x1   :  { %15 = vsyncpa [#allocation7 + $0x1], 0  ;;  %s1202_s27 = smov 0   ;;  %s1204_s28 = smov 0  }
   0x2   :  { %s1206_s29 = smov 0   ;;  %s1208_s30 = smov 0  }
   0x3 LB: > { %s1223_s9 = sadd.s32 4294967295, %s1139_s30   ;;  %s993_s10 = sadd.s32 4294967294, %s1139_s30   ;;  %s1139_s30 = sphi %s1208_s30, %s1543_s30   ;;  %s1135_s29 = sphi %s1206_s29, %s1542_s29   ;;  %s1131_s28 = sphi %s1204_s28, %s1541_s28   ;;  %s1127_s27 = sphi %s1202_s27, %s1540_s27  }
   0x4   : > { %s1227_s11 = sadd.s32 1, %s1139_s30   ;;  %s201_s12 = sadd.s32 1, %s1135_s29 }
   0x5   : > { %s198_s13 = ssub.s32 %s1139_s30, %s1227_s11  ;;  %p211_p0 = scmp.ne.s32.totalorder %s1135_s29, %s1131_s28 }
   0x6   : > { %p199_p1 = scmp.eq.s32.totalorder %s198_s13, 0  ;;  %p212_p2 = scmp.eq.s32.totalorder %s1223_s9, 1 }
   0x7   : > { %p217_p3 = scmp.ne.s32.totalorder %s1131_s28, %s1127_s27  ;;  %p218_p4 = scmp.eq.s32.totalorder %s993_s10, 1 }
   0x8   : > { %s1238_s14 = scalar_select %p199_p1, %s1135_s29, %s201_s12  }
   0x9   : > { %p1240_p5 = por %p212_p2, %p211_p0  ;;  %p1244_p6 = por %p218_p4, %p217_p3 }
   0xa   : > { %p996_p7 = scmp.ge.s32.totalorder %s1139_s30, 1  ;;  %p265_p8 = scmp.lt.s32.totalorder %s1139_s30, 3 }
   0xc   : > { %p266_p9 = pnand %p996_p7, %p265_p8 }
   0xd   : > { %s1141_s10 = smov (!%p266_p9), 111   ;;  %s1142_s17 = smov (!%p266_p9), 127  }
   0xe   : > { %269 = sbr.rel (%p266_p9) target bundleno = 949 (0x3b5), region = 52  ;;  %s1143_s18 = smov (!%p266_p9), 15  }
   0xf   : > { %s1144_s19 = smov (!%p266_p9), 113   ;;  %s1145_s20 = smov (!%p266_p9), 1  }
  0x10   : > { %s1146_s21 = smov (!%p266_p9), 17   ;;  %p299_p10 = scmp.lt.s32.totalorder (!%p266_p9), %s1223_s9, 1 }
  0x11   : > { %s1148_s12 = smov (!%p266_p9), 112   ;;  %s1149_s13 = smov (!%p266_p9), 16  }
  0x12   : > { %s1154_s24 = smov (!%p266_p9), 9   ;;  %s1155_s25 = smov (!%p266_p9), 8  }
  0x13   : > { %v310_v0 = vld [vmem:[%s1530_s1] ss:$2 sm:$0x3]  ;;  %v1000_v3 = vld [vmem:[%s1530_s1 + $0x1] ss:$2 sm:$0x3] }
  0x14   : > { %v312_v1 = vperm.slane %v310_v0, 0  ;;  %v313_v2 = vperm.slane %v310_v0, 1  ;;  %vm315_vm0 = vcmask 1043456   ;;  %v377_v4 = vperm.slane %v1000_v3, 1  ;;  %s300_s22 = scalar_select %p299_p10, %s1223_s9, 1 }
  0x15   : > { %v412_v5 = vld [vmem:[%s1530_s1] ss:$2 sm:$0x3]  ;;  %v1001_v9 = vld [vmem:[%s1530_s1 + $0x1] ss:$2 sm:$0x3] }
  0x16   : > { %v314_v6 = vrot.slane %v313_v2, 4  ;;  %v414_v7 = vperm.slane %v412_v5, 0  ;;  %v415_v8 = vperm.slane %v412_v5, 1  ;;  %v463_v12 = vperm.slane %v1001_v9, 1  ;;  %s1013_s23 = sshll.u32 %s300_s22, 3 }
  0x17   : > { %v497_v13 = vld [vmem:[%s1530_s1] ss:$2 sm:$0x3]  ;;  %v1002_v16 = vld [vmem:[%s1530_s1 + $0x1] ss:$2 sm:$0x3]  ;;  %s303_s26 = scalar_lea.vmem %s1529_s0, %s1013_s23 }
  0x18   : > { %v316_v10 = vsel %vm315_vm0, %v312_v1, %v314_v6  ;;  %v416_v11 = vrot.slane %v415_v8, 4  ;;  %v499_v14 = vperm.slane %v497_v13, 0  ;;  %v500_v15 = vperm.slane %v497_v13, 1  ;;  %v1285_v31 = vld [vmem:[%s303_s26] sm:$0xff]  ;;  %s1151_s26 = smov 119  }
  0x19   : > { %317 = vrot.lane.b32.xlu0 %v316_v10, %s1141_s10  ;;  %v376_v17 = vperm.slane %v1000_v3, 0  ;;  %v378_v18 = vrot.slane %v377_v4, 4  ;;  %v560_v21 = vperm.slane %v1002_v16, 1  ;;  %v462_v22 = vperm.slane %v1001_v9, 0 }
  0x1a   : > { %v417_v19 = vsel %vm315_vm0, %v414_v7, %v416_v11  ;;  %v501_v20 = vrot.slane %v500_v15, 4  ;;  %v464_v23 = vrot.slane %v463_v12, 4  ;;  %v559_v26 = vperm.slane %v1002_v16, 0 }
  0x1b   : > { %418 = vrot.lane.b32.xlu1 %v417_v19, %s1142_s17  ;;  %v379_v25 = vsel %vm315_vm0, %v376_v17, %v378_v18  ;;  %v561_v27 = vrot.slane %v560_v21, 4  ;;  %v1147_v30 = vmov 0.0   ;;  %vm320_vm1 = vcmask 908288  }
  0x1c   : > { %v502_v24 = vsel %vm315_vm0, %v499_v14, %v501_v20  ;;  %v465_v28 = vsel %vm315_vm0, %v462_v22, %v464_v23  ;;  %304 = vst [vmem:[#allocation2] sm:$0xff] %v1147_v30  ;;  %vm383_vm2 = vcmask 924672   ;;  %vm421_vm3 = vcmask 1039360  }
  0x1d   : > { %503 = vrot.lane.b32.xlu2 %v502_v24, %s1143_s18  ;;  %v562_v29 = vsel %vm315_vm0, %v559_v26, %v561_v27  ;;  %305 = vst [vmem:[#allocation2 + $0x8] sm:$0xff] %v1147_v30  ;;  %vm442_vm4 = vcmask 7168   ;;  %vm403_vm5 = vcmask 121856   ;;  %vm340_vm6 = vcmask 138240  }
  0x1e   : > { %307 = vst [vmem:[#allocation2 + $0x4] sm:$0xff] %v1285_v31  ;;  %vm548_vm7 = vcmask 916480   ;;  %vm364_vm8 = vcmask 130048   ;;  %vm608_vm9 = vcmask 293888   ;;  %vm737_vm12 = vcmask 519168  }
  0x1f   : > { %736 = vst [vmem:[#allocation4] sm:$0xff] %v1147_v30  ;;  %vm747_vm13 = vcmask 973824   ;;  %vm783_vm14 = vcmask 990208   ;;  %vm795_vm15 = vcmask 56320  }
  0x21   : > { %380 = vrot.lane.b32.xlu0 %v379_v25, %s1144_s19 }
  0x23   : > { %466 = vrot.lane.b32.xlu1 %v465_v28, %s1145_s20 }
  0x24   : > { %v459_v63 = vld [vmem:[#allocation2 + $0xc] sm:$0xf] }
  0x25   : > { %563 = vrot.lane.b32.xlu2 %v562_v29, %s1146_s21  ;;  %v309_v33 = vld [vmem:[#allocation2 + $0x8] sm:$0xf]  ;;  %v308_v34 = vld [vmem:[#allocation2] sm:$0xff]  ;;  %v496_v6 = vld [vmem:[#allocation2 + $0xc] sm:$0xf] }
  0x26   : > { %v348_v41 = vld [vmem:[#allocation2 + $0x8] sm:$0xf]  ;;  %v532_v15 = vld [vmem:[#allocation2 + $0xc] sm:$0xf] }
  0x27   : > { %v372_v45 = vld [vmem:[#allocation2 + $0x8] sm:$0xf]  ;;  %v556_v21 = vld [vmem:[#allocation2 + $0xc] sm:$0xf] }
  0x28   : > { %v411_v54 = vld [vmem:[#allocation2 + $0x8] sm:$0xf] }
  0x77   : > { %v504_v1 = vpop.permute.xlu2 %503 }
  0x78   : > { %v505_v5 = vrot.slane %v504_v1, 4 }
  0x7a   : > { %v510_v8 = vmul.f32 %v505_v5, %v496_v6  ;;  %v506_v13 = vsel %vm403_vm5, %v505_v5, %v504_v1  ;;  %v677_v1 = vld [vmem:[%s1533_s4 + $0x68] sm:$0xff]  ;;  %v676_v5 = vld [vmem:[%s1533_s4 + $0x60] sm:$0xff] }
  0x7b   : > { %v509_v14 = vmul.f32 %v506_v13, %v1285_v31  ;;  %v690_v13 = vld [vmem:[%s1533_s4 + $0xd0] sm:$0xff] }
  0x7f   : > { %v564_v16 = vpop.permute.xlu2 %563 }
  0x80   : > { %v565_v20 = vrot.slane %v564_v16, 4 }
  0x82   : > { %v570_v22 = vmul.f32 %v565_v20, %v556_v21  ;;  %v566_v26 = vsel %vm340_vm6, %v565_v20, %v564_v16  ;;  %v688_v21 = vld [vmem:[%s1533_s4 + $0xc0] sm:$0xff] }
  0x83   : > { %v569_v27 = vmul.f32 %v566_v26, %v1285_v31  ;;  %v669_v26 = vld [vmem:[%s1533_s4 + $0x28] sm:$0xff] }
  0x8b   : > { %v318_v32 = vpop.permute.xlu0 %317 }
  0x8c   : > { %v319_v35 = vrot.slane %v318_v32, 4 }
  0x8d   : > { %v419_v47 = vpop.permute.xlu1 %418 }
  0x8e   : > { %v321_v36 = vsel %vm320_vm1, %v319_v35, %v318_v32  ;;  %v325_v37 = vmul.f32 %v319_v35, %v309_v33  ;;  %v420_v50 = vrot.slane %v419_v47, 4 }
  0x8f   : > { %v324_v38 = vmul.f32 %v321_v36, %v308_v34 }
  0x90   : > { %330 = vst [vmem:[#allocation1 + $0x10] ss:$2 sm:$0xff] %v325_v37  ;;  %v422_v55 = vsel %vm421_vm3, %v420_v50, %v419_v47  ;;  %v426_v56 = vmul.f32 %v420_v50, %v411_v54 }
  0x91   : > { %328 = vst [vmem:[#allocation1] ss:$2 sm:$0xff] %v324_v38  ;;  %v425_v57 = vmul.f32 %v422_v55, %v308_v34 }
  0x93   : > { %v381_v39 = vpop.permute.xlu0 %380 }
  0x94   : > { %v382_v42 = vrot.slane %v381_v39, 4 }
  0x95   : > { %v467_v58 = vpop.permute.xlu1 %466 }
  0x96   : > { %v384_v46 = vsel %vm383_vm2, %v382_v42, %v381_v39  ;;  %v388_v48 = vmul.f32 %v382_v42, %v372_v45  ;;  %v468_v62 = vrot.slane %v467_v58, 4 }
  0x97   : > { %v333_v40 = vld.sshfl [vmem:[#allocation1 + $0x10] sm:$0xff pattern:$0x75316420]  ;;  %v387_v49 = vmul.f32 %v384_v46, %v308_v34 }
  0x98   : > { %v331_v43 = vld.sshfl [vmem:[#allocation1] sm:$0xff pattern:$0x75316420]  ;;  %v332_v44 = vld.sshfl [vmem:[#allocation1 + $0x8] sm:$0xff pattern:$0x75316420]  ;;  %338 = vrot.lane.b32.xlu2 %v333_v40, %s1146_s21  ;;  %v473_v0 = vmul.f32 %v468_v62, %v459_v63  ;;  %v469_v7 = vsel %vm442_vm4, %v468_v62, %v467_v58 }
  0x99   : > { %352 = vst [vmem:[#allocation1 + $0x1] ss:$2 sm:$0xff] %v308_v34  ;;  %336 = vrot.lane.b32.xlu1 %v332_v44, %s1146_s21  ;;  %334 = vrot.lane.b32.xlu0 %v331_v43, %s1146_s21  ;;  %v472_v9 = vmul.f32 %v469_v7, %v1285_v31  ;;  %v1150_v62 = vmov 0   ;;  %v678_v63 = vld [vmem:[%s1533_s4 + $0x70] sm:$0xff] }
  0x9a   : > { %354 = vst [vmem:[#allocation1 + $0x11] ss:$2 sm:$0xff] %v348_v41  ;;  %1069 = vset.pattern.permute.xlu0 %v1150_v62  ;;  %1070 = vset.pattern.permute.xlu2 %v1150_v62 }
  0xa0   : > { %v1293_v51 = vld.sshfl [vmem:[#allocation1] sm:$0xff pattern:$0x75316420]  ;;  %v1295_v52 = vld.sshfl [vmem:[#allocation1 + $0x8] sm:$0xff pattern:$0x75316420] }
  0xa1   : > { %v1297_v53 = vld.sshfl [vmem:[#allocation1 + $0x10] sm:$0xff pattern:$0x75316420]  ;;  %391 = vst [vmem:[#allocation1] ss:$2 sm:$0xff] %v387_v49 }
  0xa2   : > { %393 = vst [vmem:[#allocation1 + $0x10] ss:$2 sm:$0xff] %v388_v48 }
  0xa8   : > { %v394_v59 = vld.sshfl [vmem:[#allocation1] sm:$0xff pattern:$0x75316420]  ;;  %v395_v60 = vld.sshfl [vmem:[#allocation1 + $0x8] sm:$0xff pattern:$0x75316420] }
  0xa9   : > { %430 = vst [vmem:[#allocation1 + $0x1] ss:$2 sm:$0xff] %v425_v57  ;;  %v396_v61 = vld.sshfl [vmem:[#allocation1 + $0x10] sm:$0xff pattern:$0x75316420]  ;;  %399 = vrot.lane.b32.xlu1 %v395_v60, %s1143_s18  ;;  %397 = vrot.lane.b32.xlu0 %v394_v59, %s1143_s18  ;;  %v679_v60 = vld [vmem:[%s1533_s4 + $0x78] sm:$0xff] }
  0xaa   : > { %401 = vrot.lane.b32.xlu2 %v396_v61, %s1143_s18  ;;  %432 = vst [vmem:[#allocation1 + $0x11] ss:$2 sm:$0xff] %v426_v56  ;;  %v602_v59 = vld [vmem:[%s1532_s3] sm:$0xf]  ;;  %v695_v61 = vld [vmem:[%s1533_s4 + $0xf8] sm:$0xff]  ;;  %696 = vmatpush.msra.mxu2 %v679_v60 }
  0xab   : > { %716 = vmatpush.msra.mxu3 %v695_v61 }
  0xac   : > { %697 = vmatpush.msra.mxu2 %v678_v63 }
  0xae   : > { %698 = vmatpush.msra.mxu2 %v677_v1 }
  0xb0   : > { %v434_v2 = vld.sshfl [vmem:[#allocation1 + $0x8] sm:$0xff pattern:$0x75316420]  ;;  %v433_v3 = vld.sshfl [vmem:[#allocation1] sm:$0xff pattern:$0x75316420]  ;;  %699 = vmatpush.msra.mxu2 %v676_v5 }
  0xb1   : > { %v435_v4 = vld.sshfl [vmem:[#allocation1 + $0x10] sm:$0xff pattern:$0x75316420]  ;;  %438 = vrot.lane.b32.xlu1 %v434_v2, %s1145_s20  ;;  %436 = vrot.lane.b32.xlu0 %v433_v3, %s1145_s20  ;;  %451 = vst [vmem:[#allocation1] ss:$2 sm:$0xff] %v1285_v31  ;;  %v693_v2 = vld [vmem:[%s1533_s4 + $0xe8] sm:$0xff] }
  0xb2   : > { %440 = vrot.lane.b32.xlu2 %v435_v4, %s1145_s20  ;;  %479 = vst [vmem:[#allocation1 + $0x11] ss:$2 sm:$0xff] %v473_v0  ;;  %v694_v0 = vld [vmem:[%s1533_s4 + $0xf0] sm:$0xff] }
  0xb3   : > { %717 = vmatpush.msra.mxu3 %v694_v0 }
  0xb5   : > { %718 = vmatpush.msra.mxu3 %v693_v2 }
  0xb8   : > { %v452_v10 = vld.sshfl [vmem:[#allocation1] sm:$0xff pattern:$0x75316420]  ;;  %v453_v11 = vld.sshfl [vmem:[#allocation1 + $0x8] sm:$0xff pattern:$0x75316420] }
  0xb9   : > { %v482_v12 = vld.sshfl [vmem:[#allocation1 + $0x10] sm:$0xff pattern:$0x75316420]  ;;  %477 = vst [vmem:[#allocation1 + $0x1] ss:$2 sm:$0xff] %v472_v9  ;;  %v675_v9 = vld [vmem:[%s1533_s4 + $0x58] sm:$0xff] }
  0xba   : > { %487 = vrot.lane.b32.xlu2 %v482_v12, %s1142_s17  ;;  %515 = vst [vmem:[#allocation1 + $0x10] ss:$2 sm:$0xff] %v510_v8  ;;  %v692_v8 = vld [vmem:[%s1533_s4 + $0xe0] sm:$0xff]  ;;  %700 = vmatpush.msra.mxu2 %v675_v9 }
  0xbb   : > { %456 = vst [vmem:[#allocation3 + $0x48] sm:$0xf] %v452_v10  ;;  %v691_v10 = vld [vmem:[%s1533_s4 + $0xd8] sm:$0xff]  ;;  %719 = vmatpush.msra.mxu3 %v692_v8 }
  0xbc   : > { %457 = vst [vmem:[#allocation3 + $0x28] sm:$0xf] %v453_v11  ;;  %v674_v11 = vld [vmem:[%s1533_s4 + $0x50] sm:$0xff] }
  0xbd   : > { %720 = vmatpush.msra.mxu3 %v691_v10  ;;  %701 = vmatpush.msra.mxu2 %v674_v11 }
  0xbf   : > { %721 = vmatpush.msra.mxu3 %v690_v13 }
  0xc0   : > { %v481_v17 = vld.sshfl [vmem:[#allocation1 + $0x8] sm:$0xff pattern:$0x75316420]  ;;  %v480_v18 = vld.sshfl [vmem:[#allocation1] sm:$0xff pattern:$0x75316420] }
  0xc1   : > { %v518_v19 = vld.sshfl [vmem:[#allocation1 + $0x10] sm:$0xff pattern:$0x75316420]  ;;  %485 = vrot.lane.b32.xlu1 %v481_v17, %s1142_s17  ;;  %483 = vrot.lane.b32.xlu0 %v480_v18, %s1142_s17  ;;  %513 = vst [vmem:[#allocation1] ss:$2 sm:$0xff] %v509_v14  ;;  %v673_v14 = vld [vmem:[%s1533_s4 + $0x48] sm:$0xff] }
  0xc2   : > { %523 = vrot.lane.b32.xlu2 %v518_v19, %s1144_s19  ;;  %538 = vst [vmem:[#allocation1 + $0x11] ss:$2 sm:$0xff] %v532_v15  ;;  %v689_v15 = vld [vmem:[%s1533_s4 + $0xc8] sm:$0xff]  ;;  %v672_v18 = vld [vmem:[%s1533_s4 + $0x40] sm:$0xff]  ;;  %702 = vmatpush.msra.mxu2 %v673_v14 }
  0xc3   : > { %722 = vmatpush.msra.mxu3 %v689_v15 }
  0xc4   : > { %703 = vmatpush.msra.mxu2 %v672_v18 }
  0xc5   : > { %723 = vmatpush.msra.mxu3 %v688_v21 }
  0xc8   : > { %v517_v23 = vld.sshfl [vmem:[#allocation1 + $0x8] sm:$0xff pattern:$0x75316420]  ;;  %v516_v24 = vld.sshfl [vmem:[#allocation1] sm:$0xff pattern:$0x75316420] }
  0xc9   : > { %v541_v25 = vld.sshfl [vmem:[#allocation1 + $0x10] sm:$0xff pattern:$0x75316420]  ;;  %521 = vrot.lane.b32.xlu1 %v517_v23, %s1144_s19  ;;  %519 = vrot.lane.b32.xlu0 %v516_v24, %s1144_s19  ;;  %536 = vst [vmem:[#allocation1 + $0x1] ss:$2 sm:$0xff] %v1285_v31  ;;  %v687_v23 = vld [vmem:[%s1533_s4 + $0xb8] sm:$0xff] }
  0xca   : > { %546 = vrot.lane.b32.xlu2 %v541_v25, %s1148_s12  ;;  %575 = vst [vmem:[#allocation1 + $0x10] ss:$2 sm:$0xff] %v570_v22  ;;  %v671_v22 = vld [vmem:[%s1533_s4 + $0x38] sm:$0xff]  ;;  %v670_v24 = vld [vmem:[%s1533_s4 + $0x30] sm:$0xff]  ;;  %724 = vmatpush.msra.mxu3 %v687_v23  ;;  %s1010_s19 = sshll.u32 %s1223_s9, 3 }
  0xcb   : > { %704 = vmatpush.msra.mxu2 %v671_v22  ;;  %v686_v25 = vld [vmem:[%s1533_s4 + $0xb0] sm:$0xff]  ;;  %s929_s23 = scalar_lea.hbm %s1537_s8, %s1010_s19 }
  0xcc   : > { %725 = vmatpush.msra.mxu3 %v686_v25 }
  0xcd   : > { %705 = vmatpush.msra.mxu2 %v670_v24 }
  0xcf   : > { %706 = vmatpush.msra.mxu2 %v669_v26 }
  0xd0   : > { %v540_v28 = vld.sshfl [vmem:[#allocation1 + $0x8] sm:$0xff pattern:$0x75316420]  ;;  %v539_v29 = vld.sshfl [vmem:[#allocation1] sm:$0xff pattern:$0x75316420] }
  0xd1   : > { %v578_v30 = vld.sshfl [vmem:[#allocation1 + $0x10] sm:$0xff pattern:$0x75316420]  ;;  %544 = vrot.lane.b32.xlu1 %v540_v28, %s1148_s12  ;;  %542 = vrot.lane.b32.xlu0 %v539_v29, %s1148_s12  ;;  %573 = vst [vmem:[#allocation1] ss:$2 sm:$0xff] %v569_v27  ;;  %v685_v28 = vld [vmem:[%s1533_s4 + $0xa8] sm:$0xff] }
  0xd2   : > { %583 = vrot.lane.b32.xlu2 %v578_v30, %s1141_s10  ;;  %726 = vmatpush.msra.mxu3 %v685_v28  ;;  %s1152_s12 = smov 7  }
  0xd8   : > { %v577_v32 = vld.sshfl [vmem:[#allocation1 + $0x8] sm:$0xff pattern:$0x75316420]  ;;  %v576_v33 = vld.sshfl [vmem:[#allocation1] sm:$0xff pattern:$0x75316420] }
  0xd9   : > { %581 = vrot.lane.b32.xlu1 %v577_v32, %s1141_s10  ;;  %579 = vrot.lane.b32.xlu0 %v576_v33, %s1141_s10  ;;  %v668_v32 = vld [vmem:[%s1533_s4 + $0x20] sm:$0xff]  ;;  %s296_s10 = sand.u32 1, %s1131_s28  }
  0xda   : > { %362 = vrot.lane.b32.xlu2 %v1297_v53, %s1149_s13  ;;  %707 = vmatpush.msra.mxu2 %v668_v32  ;;  %s997_s18 = sshll.u32 %s296_s10, 3 }
  0xe1   : > { %360 = vrot.lane.b32.xlu1 %v1295_v52, %s1149_s13  ;;  %358 = vrot.lane.b32.xlu0 %v1293_v51, %s1149_s13  ;;  %s1153_s13 = smov 121  }
  0xe9   : > { %605 = vperm.xlu0 %1069, %v602_v59   ;;  %v1073_v59 = vld [vmem:[%s1534_s5 + $0x1] ss:$0 sm:$0xff] }
  0xf2   : > { %v339_v31 = vpop.permute.xlu2 %338 }
 0x104   : > { %v402_v38 = vpop.permute.xlu2 %401 }
 0x10b   : > { %v337_v34 = vpop.permute.xlu1 %336  ;;  %v335_v35 = vpop.permute.xlu0 %334 }
 0x10c   : > { %v342_v36 = vsel %vm340_vm6, %v337_v34, %v339_v31  ;;  %v341_v37 = vsel %vm340_vm6, %v335_v35, %v337_v34  ;;  %v441_v43 = vpop.permute.xlu2 %440  ;;  %v684_v35 = vld [vmem:[%s1533_s4 + $0xa0] sm:$0xff] }
 0x10d   : > { %346 = vst [vmem:[#allocation3] sm:$0xf] %v342_v36  ;;  %727 = vmatpush.msra.mxu3 %v684_v35 }
 0x10e   : > { %345 = vst [vmem:[#allocation3 + $0x30] sm:$0xf] %v341_v37  ;;  %v667_v37 = vld [vmem:[%s1533_s4 + $0x18] sm:$0xff] }
 0x10f   : > { %708 = vmatpush.msra.mxu2 %v667_v37 }
 0x114   : > { %v488_v48 = vpop.permute.xlu2 %487 }
 0x11b   : > { %v400_v39 = vpop.permute.xlu1 %399  ;;  %v398_v40 = vpop.permute.xlu0 %397 }
 0x11c   : > { %v405_v41 = vsel %vm403_vm5, %v400_v39, %v402_v38  ;;  %v404_v42 = vsel %vm403_vm5, %v398_v40, %v400_v39  ;;  %v524_v51 = vpop.permute.xlu2 %523  ;;  %v683_v39 = vld [vmem:[%s1533_s4 + $0x98] sm:$0xff] }
 0x11d   : > { %409 = vst [vmem:[#allocation3 + $0x10] sm:$0xf] %v405_v41  ;;  %728 = vmatpush.msra.mxu3 %v683_v39 }
 0x11e   : > { %408 = vst [vmem:[#allocation3 + $0x18] sm:$0xf] %v404_v42 }
 0x123   : > { %v439_v44 = vpop.permute.xlu1 %438  ;;  %v437_v45 = vpop.permute.xlu0 %436 }
 0x124   : > { %v444_v46 = vsel %vm442_vm4, %v439_v44, %v441_v43  ;;  %v443_v47 = vsel %vm442_vm4, %v437_v45, %v439_v44  ;;  %v547_v58 = vpop.permute.xlu2 %546  ;;  %v591_v45 = vld [vmem:[%s1531_s2] sm:$0xf] }
 0x125   : > { %448 = vst [vmem:[#allocation3 + $0x10] sm:$0xf0] %v444_v46 }
 0x126   : > { %447 = vst [vmem:[#allocation3 + $0x18] sm:$0xf0] %v443_v47 }
 0x12c   : > { %v584_v12 = vpop.permute.xlu2 %583  ;;  %v595_v43 = vld [vmem:[#allocation3 + $0x10] sm:$0xff] }
 0x12d   : > { %v594_v44 = vld [vmem:[#allocation3 + $0x18] sm:$0xff] }
 0x133   : > { %v486_v49 = vpop.permute.xlu1 %485  ;;  %v484_v50 = vpop.permute.xlu0 %483 }
 0x134   : > { %v490_v52 = vsel %vm421_vm3, %v486_v49, %v488_v48  ;;  %v489_v53 = vsel %vm421_vm3, %v484_v50, %v486_v49  ;;  %v363_v27 = vpop.permute.xlu2 %362  ;;  %v666_v48 = vld [vmem:[%s1533_s4 + $0x10] sm:$0xff]  ;;  %v665_v50 = vld [vmem:[%s1533_s4 + $0x8] sm:$0xff] }
 0x135   : > { %494 = vst [vmem:[#allocation3 + $0x28] sm:$0xf0] %v490_v52  ;;  %v682_v49 = vld [vmem:[%s1533_s4 + $0x90] sm:$0xff]  ;;  %709 = vmatpush.msra.mxu2 %v666_v48  ;;  %v664_v52 = vld [vmem:[%s1533_s4] sm:$0xff] }
 0x136   : > { %493 = vst [vmem:[#allocation3 + $0x48] sm:$0xf0] %v489_v53  ;;  %729 = vmatpush.msra.mxu3 %v682_v49  ;;  %v680_v53 = vld [vmem:[%s1533_s4 + $0x80] sm:$0xff] }
 0x137   : > { %710 = vmatpush.msra.mxu2 %v665_v50 }
 0x139   : > { %711 = vmatpush.msra.mxu2 %v664_v52 }
 0x13b   : > { %v522_v54 = vpop.permute.xlu1 %521  ;;  %v520_v55 = vpop.permute.xlu0 %519 }
 0x13c   : > { %v526_v56 = vsel %vm383_vm2, %v522_v54, %v524_v51  ;;  %v525_v57 = vsel %vm383_vm2, %v520_v55, %v522_v54  ;;  %v597_v41 = vld [vmem:[#allocation3 + $0x28] sm:$0xff]  ;;  %v681_v51 = vld [vmem:[%s1533_s4 + $0x88] sm:$0xff]  ;;  %vm772_vm2 = vcmask 64512  }
 0x13d   : > { %530 = vst [vmem:[#allocation3 + $0x20] sm:$0xf] %v526_v56  ;;  %v596_v42 = vld [vmem:[#allocation3 + $0x48] sm:$0xff]  ;;  %730 = vmatpush.msra.mxu3 %v681_v51 }
 0x13e   : > { %529 = vst [vmem:[#allocation3 + $0x8] sm:$0xf] %v525_v57  ;;  %v1071_v54 = vld [vmem:[%s1534_s5] ss:$0 sm:$0xff]  ;;  %v1075_v56 = vld [vmem:[%s1534_s5 + $0x1] ss:$0 sm:$0xff] }
 0x13f   : > { %731 = vmatpush.msra.mxu3 %v680_v53  ;;  %v1074_v55 = vld [vmem:[%s1534_s5] ss:$0 sm:$0xff]  ;;  %744 = vrot.lane.b32.xlu1 %v1071_v54, %s1151_s26 }
 0x140   : > { %841 = vrot.lane.b32.xlu0 %v1074_v55, %s1152_s12  ;;  %780 = vrot.lane.b32.xlu2 %v1075_v56, %s1153_s13  ;;  %v1072_v57 = vld [vmem:[%s1534_s5] ss:$0 sm:$0xff] }
 0x141   : > { %v881_v53 = vld [vmem:[%s1536_s7] sm:$0xff] }
 0x143   : > { %v545_v3 = vpop.permute.xlu1 %544  ;;  %v543_v4 = vpop.permute.xlu0 %542 }
 0x144   : > { %v550_v6 = vsel %vm548_vm7, %v545_v3, %v547_v58  ;;  %v549_v7 = vsel %vm548_vm7, %v543_v4, %v545_v3  ;;  %v1076_v58 = vld [vmem:[%s1534_s5 + $0x1] ss:$0 sm:$0xff] }
 0x145   : > { %554 = vst [vmem:[#allocation3 + $0x20] sm:$0xf0] %v550_v6 }
 0x146   : > { %553 = vst [vmem:[#allocation3 + $0x8] sm:$0xf0] %v549_v7 }
 0x147   : > { %803 = vrot.lane.b32.xlu1 %v1072_v57, %s1142_s17 }
 0x148   : > { %826 = vrot.lane.b32.xlu2 %v1076_v58, %s1145_s20 }
 0x14b   : > { %v582_v16 = vpop.permute.xlu1 %581  ;;  %v580_v17 = vpop.permute.xlu0 %579 }
 0x14c   : > { %v586_v19 = vsel %vm320_vm1, %v582_v16, %v584_v12  ;;  %v585_v20 = vsel %vm320_vm1, %v580_v17, %v582_v16  ;;  %v599_v38 = vld [vmem:[#allocation3 + $0x20] sm:$0xff]  ;;  %vm759_vm1 = vcmask 72704  }
 0x14d   : > { %590 = vst [vmem:[#allocation3 + $0x38] sm:$0xf] %v586_v19  ;;  %v598_v40 = vld [vmem:[#allocation3 + $0x8] sm:$0xff] }
 0x14e   : > { %589 = vst [vmem:[#allocation3 + $0x40] sm:$0xf] %v585_v20 }
 0x14f   : > { %864 = vrot.lane.b32.xlu1 %v1073_v59, %s1154_s24 }
 0x153   : > { %v361_v29 = vpop.permute.xlu1 %360  ;;  %v359_v30 = vpop.permute.xlu0 %358 }
 0x154   : > { %v366_v33 = vsel %vm364_vm8, %v361_v29, %v363_v27  ;;  %v365_v31 = vsel %vm364_vm8, %v359_v30, %v361_v29  ;;  %v601_v34 = vld [vmem:[#allocation3 + $0x38] sm:$0xf] }
 0x155   : > { %370 = vst [vmem:[#allocation3] sm:$0xf0] %v366_v33  ;;  %v600_v36 = vld [vmem:[#allocation3 + $0x40] sm:$0xf]  ;;  %1005 = vmatpush.msk.msra.mxu1 %vm315_vm0, %v601_v34 }
 0x156   : > { %369 = vst [vmem:[#allocation3 + $0x30] sm:$0xf0] %v365_v31  ;;  %1003 = vmatpush.msk.msra.mxu0 %vm315_vm0, %v600_v36 }
 0x157   : > { %650 = vmatpush.msra.mxu1 %v599_v38 }
 0x158   : > { %630 = vmatpush.msra.mxu0 %v598_v40 }
 0x159   : > { %651 = vmatpush.msra.mxu1 %v597_v41 }
 0x15a   : > { %631 = vmatpush.msra.mxu0 %v596_v42 }
 0x15b   : > { %652 = vmatpush.msra.mxu1 %v595_v43  ;;  %v606_v60 = vpop.permute.xlu0 %605 }
 0x15c   : > { %632 = vmatpush.msra.mxu0 %v594_v44  ;;  %v593_v46 = vld [vmem:[#allocation3] sm:$0xff] }
 0x15d   : > { %v592_v47 = vld [vmem:[#allocation3 + $0x30] sm:$0xff]  ;;  %653 = vmatpush.msra.mxu1 %v593_v46 }
 0x15e   : > { %633 = vmatpush.msra.mxu0 %v592_v47  ;;  %1006 = vmatmul.msk.f32.vlgmr.msra.gmra.mxu1 %vm608_vm9, %v591_v45 }
 0x15f   : > { %1004 = vmatmul.msk.f32.vlgmr.msra.gmra.mxu0 %vm608_vm9, %v591_v45 }
 0x19a   : > { %v781_v14 = vpop.permute.xlu2 %780 }
 0x19b   : > { %v782_v15 = vrot.slane %v781_v14, 4 }
 0x19d   : > { %v784_v18 = vsel %vm783_vm14, %v782_v15, %v781_v14 }
 0x1a2   : > { %v827_v28 = vpop.permute.xlu2 %826 }
 0x1b1   : > { %v745_v8 = vpop.permute.xlu1 %744 }
 0x1b2   : > { %v746_v9 = vrot.slane %v745_v8, 4  ;;  %v842_v31 = vpop.permute.xlu0 %841 }
 0x1b4   : > { %v748_v10 = vsel %vm747_vm13, %v746_v9, %v745_v8 }
 0x1b9   : > { %v804_v19 = vpop.permute.xlu1 %803 }
 0x1ba   : > { %v805_v21 = vrot.slane %v804_v19, 4 }
 0x1bc   : > { %v806_v24 = vsel %vm421_vm3, %v805_v21, %v804_v19  ;;  %vm916_vm3 = vcmask 523264  }
 0x1c1   : > { %v865_v39 = vpop.permute.xlu1 %864 }
 0x1db   : > { %v655_v61 = vpop.f32.mrf.mxu1 }
 0x1dc   : > { %v656_v62 = vadd.f32 %v655_v61, %v606_v60  ;;  %v635_v63 = vpop.f32.mrf.mxu0 }
 0x1dd   : > { %v636_v0 = vadd.f32 %v635_v63, %v606_v60 }
 0x1de   : > { %vm659_vm10 = vcmp.gt.f32.partialorder %v656_v62, 0.0  ;;  %v661_v1 = vmul.f32 0.2, %v656_v62 }
 0x1df   : > { %vm658_vm11 = vcmp.gt.f32.partialorder %v636_v0, 0.0  ;;  %v660_v2 = vmul.f32 0.2, %v636_v0 }
 0x1e0   : > { %v663_v3 = vsel %vm659_vm10, %v656_v62, %v661_v1  ;;  %v875_v1 = vld [vmem:[%s1535_s6] sm:$0xff] }
 0x1e1   : > { %v662_v4 = vsel %vm658_vm11, %v636_v0, %v660_v2  ;;  %732 = vmatmul.f32.vlgmr.msra.gmra.mxu3 %v663_v3 }
 0x1e2   : > { %712 = vmatmul.f32.vlgmr.msra.gmra.mxu2 %v662_v4 }
 0x264   : > { %v733_v5 = vpop.f32.mrf.mxu3 }
 0x265   : > { %v713_v6 = vpop.f32.mrf.mxu2 }
 0x266   : > { %v734_v7 = vadd.f32 %v733_v5, %v713_v6 }
 0x268   : > { %739 = vst.msk [vmem:[#allocation4 + $0x4] sm:$0xf] %vm737_vm12, %v734_v7 }
 0x26f   : > { %v740_v11 = vld [vmem:[#allocation4] sm:$0xff] }
 0x270   : > { %v750_v12 = vmul.f32 %v748_v10, %v740_v11  ;;  %v820_v13 = vld [vmem:[#allocation4 + $0x4] sm:$0xf]  ;;  %v786_v20 = vmul.f32 %v784_v18, %v740_v11  ;;  %v808_v25 = vmul.f32 %v806_v24, %v740_v11 }
 0x271   : > { %821 = vst.msk [vmem:[#allocation5 + $0x10] sm:$0xf] %vm737_vm12, %v820_v13  ;;  %v822_v29 = vld [vmem:[#allocation4 + $0x4] sm:$0xf] }
 0x272   : > { %752 = vst [vmem:[#allocation1] ss:$2 sm:$0xff] %v750_v12  ;;  %v829_v30 = vmul.f32 %v827_v28, %v822_v29  ;;  %v837_v34 = vld [vmem:[#allocation4 + $0x4] sm:$0xf] }
 0x273   : > { %v844_v35 = vmul.f32 %v842_v31, %v837_v34  ;;  %v852_v37 = vld [vmem:[#allocation4 + $0x4] sm:$0xf] }
 0x274   : > { %v860_v40 = vld [vmem:[#allocation4 + $0x4] sm:$0xf] }
 0x275   : > { %v867_v41 = vmul.f32 %v865_v39, %v860_v40 }
 0x279   : > { %v753_v16 = vld.sshfl [vmem:[#allocation1] sm:$0xff pattern:$0x75316420]  ;;  %v754_v17 = vld.sshfl [vmem:[#allocation1 + $0x8] sm:$0xff pattern:$0x75316420] }
 0x27a   : > { %755 = vrot.lane.b32.xlu1 %v753_v16, %s1154_s24  ;;  %765 = vst [vmem:[#allocation1] ss:$2 sm:$0xff] %v740_v11 }
 0x281   : > { %v766_v22 = vld.sshfl [vmem:[#allocation1] sm:$0xff pattern:$0x75316420]  ;;  %v767_v23 = vld.sshfl [vmem:[#allocation1 + $0x8] sm:$0xff pattern:$0x75316420] }
 0x282   : > { %788 = vst [vmem:[#allocation1] ss:$2 sm:$0xff] %v786_v20 }
 0x289   : > { %v790_v26 = vld.sshfl [vmem:[#allocation1 + $0x8] sm:$0xff pattern:$0x75316420]  ;;  %v789_v27 = vld.sshfl [vmem:[#allocation1] sm:$0xff pattern:$0x75316420] }
 0x28a   : > { %793 = vrot.lane.b32.xlu1 %v790_v26, %s1152_s12  ;;  %791 = vrot.lane.b32.xlu0 %v789_v27, %s1152_s12  ;;  %810 = vst [vmem:[#allocation1] ss:$2 sm:$0xff] %v808_v25 }
 0x291   : > { %v812_v32 = vld.sshfl [vmem:[#allocation1 + $0x8] sm:$0xff pattern:$0x75316420]  ;;  %v811_v33 = vld.sshfl [vmem:[#allocation1] sm:$0xff pattern:$0x75316420] }
 0x292   : > { %815 = vrot.lane.b32.xlu0 %v812_v32, %s1145_s20  ;;  %813 = vrot.lane.b32.xlu2 %v811_v33, %s1145_s20  ;;  %831 = vst [vmem:[#allocation1] ss:$2 sm:$0xff] %v829_v30  ;;  %s1156_s20 = smov 120  }
 0x299   : > { %v832_v36 = vld.sshfl [vmem:[#allocation1] sm:$0xff pattern:$0x75316420] }
 0x29a   : > { %833 = vrot.lane.b32.xlu2 %v832_v36, %s1142_s17  ;;  %846 = vst [vmem:[#allocation1] ss:$2 sm:$0xff] %v844_v35  ;;  %s919_s17 = scalar_lea.sflag [#allocation7], %s296_s10 }
 0x2a1   : > { %v847_v38 = vld.sshfl [vmem:[#allocation1] sm:$0xff pattern:$0x75316420] }
 0x2a2   : > { %848 = vrot.lane.b32.xlu0 %v847_v38, %s1153_s13  ;;  %854 = vst [vmem:[#allocation1] ss:$2 sm:$0xff] %v852_v37 }
 0x2a9   : > { %v855_v42 = vld.sshfl [vmem:[#allocation1] sm:$0xff pattern:$0x75316420] }
 0x2aa   : > { %768 = vrot.lane.b32.xlu0 %v766_v22, %s1155_s25  ;;  %856 = vrot.lane.b32.xlu1 %v855_v42, %s1156_s20  ;;  %869 = vst [vmem:[#allocation1] ss:$2 sm:$0xff] %v867_v41  ;;  %s933_s20 = sshll.u32 %s929_s23, 4  ;;  %s934_s20 = int_to_ptr.hbm [resolvable:$true] %s933_s20 }
 0x2ab   : > { %s1091_s9 = sshra.s32 %s934_s20, 4  ;;  %s1092_s9 = int_to_ptr.hbm [resolvable:$true] %s1091_s9 }
 0x2ac   : > { %p1098_p0 = scmp.lt.s32.totalorder %s1092_s9, %s1537_s8 }
 0x2b1   : > { %v870_v43 = vld.sshfl [vmem:[#allocation1] sm:$0xff pattern:$0x75316420] }
 0x2b2   : > { %770 = vrot.lane.b32.xlu1 %v767_v23, %s1155_s25  ;;  %871 = vrot.lane.b32.xlu2 %v870_v43, %s1151_s26  ;;  %s1093_s26 = scalar_lea.hbm %s1092_s9, 8 }
 0x2b3   : > { %p1094_p11 = scmp.ne.s32.totalorder %s1092_s9, %s1093_s26 }
 0x2b5   : > { %p1095_p12 = pnand %p1094_p11, %p1240_p5 }
 0x2b7   : > { %p1096_p13 = pneg %p1095_p12 }
 0x2ba   : > { %757 = vrot.lane.b32.xlu2 %v754_v17, %s1154_s24  ;;  %s298_s24 = scalar_lea.vmem [#allocation6], %s997_s18  ;;  %s1097_s18 = scalar_lea.hbm %s1537_s8, 16 }
 0x2bb   : > { %s931_s25 = sshll.u32 %s298_s24, 4  ;;  %p1099_p1 = scmp.lt.s32.totalorder %s1097_s18, %s1093_s26  ;;  %s932_s25 = int_to_ptr.vmem [resolvable:$true] %s931_s25 }
 0x2bd   : > { %p1100_p2 = por %p1099_p1, %p1098_p0 }
 0x2bf   : > { %p1101_p3 = pnand %p1100_p2, %p1096_p13 }
 0x2c2   : > { %884 = vperm.xlu2 %1070, %v881_v53  }
 0x2ec   : > { %v814_v44 = vpop.permute.xlu2 %813  ;;  %v756_v45 = vpop.permute.xlu1 %755 }
 0x2f4   : > { %v834_v46 = vpop.permute.xlu2 %833 }
 0x2f5   : > { %836 = vst.msk [vmem:[#allocation5 + $0x14] sm:$0xf] %vm737_vm12, %v834_v46 }
 0x2fc   : > { %v794_v47 = vpop.permute.xlu1 %793  ;;  %v792_v48 = vpop.permute.xlu0 %791  ;;  %v878_v63 = vld [vmem:[#allocation5 + $0x10] sm:$0xff] }
 0x2fd   : > { %v796_v49 = vsel %vm795_vm15, %v792_v48, %v794_v47 }
 0x2fe   : > { %798 = vst.msk [vmem:[#allocation5 + $0x8] sm:$0xf] %vm737_vm12, %v796_v49 }
 0x304   : > { %v816_v50 = vpop.permute.xlu0 %815 }
 0x305   : > { %v817_v51 = vsel %vm442_vm4, %v814_v44, %v816_v50 }
 0x306   : > { %819 = vst.msk [vmem:[#allocation5 + $0xc] sm:$0xf] %vm737_vm12, %v817_v51 }
 0x30c   : > { %v872_v52 = vpop.permute.xlu2 %871 }
 0x30d   : > { %874 = vst.msk [vmem:[#allocation5 + $0x20] sm:$0xf] %vm737_vm12, %v872_v52  ;;  %v877_v0 = vld [vmem:[#allocation5 + $0x8] sm:$0xff] }
 0x314   : > { %v849_v54 = vpop.permute.xlu0 %848  ;;  %v758_v55 = vpop.permute.xlu2 %757  ;;  %v880_v56 = vld [vmem:[#allocation5 + $0x20] sm:$0xf] }
 0x315   : > { %851 = vst.msk [vmem:[#allocation5 + $0x18] sm:$0xf] %vm737_vm12, %v849_v54  ;;  %v760_v57 = vsel %vm759_vm1, %v756_v45, %v758_v55  ;;  %1007 = vmatpush.msk.msrb.mxu0 %vm315_vm0, %v880_v56 }
 0x316   : > { %762 = vst.msk [vmem:[#allocation5] sm:$0xf] %vm737_vm12, %v760_v57 }
 0x31c   : > { %v857_v58 = vpop.permute.xlu1 %856  ;;  %v769_v59 = vpop.permute.xlu0 %768 }
 0x31d   : > { %859 = vst.msk [vmem:[#allocation5 + $0x1c] sm:$0xf] %vm737_vm12, %v857_v58  ;;  %v885_v3 = vpop.permute.xlu2 %884 }
 0x324   : > { %v771_v60 = vpop.permute.xlu1 %770  ;;  %v879_v61 = vld [vmem:[#allocation5 + $0x18] sm:$0xff] }
 0x325   : > { %v773_v62 = vsel %vm772_vm2, %v769_v59, %v771_v60  ;;  %905 = vmatpush.msrb.mxu0 %v879_v61 }
 0x326   : > { %775 = vst.msk [vmem:[#allocation5 + $0x4] sm:$0xf] %vm737_vm12, %v773_v62 }
 0x327   : > { %906 = vmatpush.msrb.mxu0 %v878_v63 }
 0x329   : > { %907 = vmatpush.msrb.mxu0 %v877_v0 }
 0x32d   : > { %v876_v2 = vld [vmem:[#allocation5] sm:$0xff] }
 0x32e   : > { %908 = vmatpush.msrb.mxu0 %v876_v2 }
 0x32f   : > { %1008 = vmatmul.msk.f32.vlgmr.msrb.gmra.mxu0 %vm608_vm9, %v875_v1 }
 0x3ac   : > { %v910_v4 = vpop.f32.mrf.mxu0 }
 0x3ad   : > { %v911_v5 = vadd.f32 %v910_v4, %v885_v3 }
 0x3af   : > { %vm913_vm0 = vcmp.gt.f32.partialorder %v911_v5, 0.0  ;;  %v914_v6 = vmul.f32 0.2, %v911_v5 }
 0x3b1   : > { %v915_v7 = vsel %vm913_vm0, %v911_v5, %v914_v6 }
 0x3b2   : > { %917 = vst.msk [vmem:[%s298_s24] sm:$0xff] %vm916_vm3, %v915_v7 }
 0x3b3   : > { %1104 = shalt.err (!%p1101_p3)
}
 0x3b4   : > { %1014 = dma.vmem_to_hbm [thread:$0]  (%p1240_p5), %s932_s25, 128, %s934_s20, %s919_s17  }
 0x3b5 PF: > { %p1020_p4 = scmp.ge.s32.totalorder %s1139_s30, 2  ;;  %s945_s10 = sand.u32 1, %s1127_s27  }
 0x3b6   : > { %s946_s22 = scalar_lea.sflag [#allocation7], %s945_s10 }
 0x3b7   : > { %p1017_p7 = pnand %p1020_p4, %p1244_p6 }
 0x3b9   : > { %p1018_p8 = pneg %p1017_p7 }
 0x3bb   : > { %1122 = dma.done.wait (%p1018_p8), %s946_s22, 128  }
 0x3bc   : > { %1124 = vsyncadd (%p1018_p8), %s946_s22, 4294967168  ;;  %p18_p9 = scmp.ge.s32.totalorder %s1227_s11, 4   ;;  %s1540_s27 = smov %s1131_s28 }
 0x3bd   : > { %s1541_s28 = smov %s1135_s29  ;;  %s1542_s29 = smov %s1238_s14 }
 0x3be   : > { %s1543_s30 = smov %s1227_s11  ;;  %20 = sbr.rel (!%p18_p9) target bundleno = 3 (0x3), region = 100 }
 0x3c3   :  { %952 = vsyncpa [#allocation7], 1 }
 0x3c4   :  { %954 = vsyncpa [#allocation7 + $0x1], 1 }

</bundles_post_ra>
